<compile_context>
chip_gen: v6e
topology: v6e:2x2x1
jax: 0.10.0
libtpu: 0.0.40
codegen_flags: <defaults>
</compile_context>

<pallas_src>
import functools
import math

import numpy as np

import jax
import jax.numpy as jnp
from jax.experimental import pallas as pl
from jax.experimental.pallas import tpu as pltpu


# ----------------------------- kernels ---------------------------------------


def _norm_scale_store(x_ref, g_ref, o_ref, ss, *, eps2):
    """inv = rsqrt(max(ss, eps^2)); out = x * inv * gamma_scaled."""
    inv = jax.lax.rsqrt(jnp.maximum(ss, eps2))        # EUP; == 1 / max(||x||, eps)
    g = g_ref[0, 0]                                    # (L,), pre-scaled, compute dtype
    x = x_ref[0, 0].astype(g.dtype)                    # re-read ref in compute dtype
    o_ref[0, 0] = (x * inv.astype(g.dtype) * g[None, :]).astype(o_ref.dtype)


def _kernel_rowsum(x_ref, g_ref, o_ref, *, eps2):
    # pack == 1 (D >= 128): plain full-row reduction (XLU).  The f32 view is
    # consumed by the reduction only; it is not kept live for the multiply.
    xf = x_ref[0, 0].astype(jnp.float32)               # (TM, L)
    ss = jnp.sum(xf * xf, axis=-1, keepdims=True)      # (TM, 1)
    _norm_scale_store(x_ref, g_ref, o_ref, ss, eps2=eps2)


def _kernel_segsum_mxu(x_ref, g_ref, a_ref, o_ref, *, eps2):
    # pack > 1 (D < 128, lane-packed): per-segment sums via one matmul with a
    # constant block-diagonal ones matrix.  Each lane of `ss` holds the sum of
    # squares of its own D-wide segment, so no masks / selects / broadcasts.
    xf = x_ref[0, 0].astype(jnp.float32)               # (TM, L)
    ss = jnp.dot(
        xf * xf,
        a_ref[...],                                    # (L, L) block-diagonal 0/1
        precision=jax.lax.Precision.HIGHEST,           # near-f32-exact on the MXU
        preferred_element_type=jnp.float32,
    )                                                  # (TM, L)
    _norm_scale_store(x_ref, g_ref, o_ref, ss, eps2=eps2)


# ----------------------------- wrapper ----------------------------------------


def _pick_tm(M, max_rows, sub, n_bh, min_steps=8):
    """Rows per N-tile: largest VMEM-safe block, >= min_steps total grid points,
    rounded to the dtype sublane multiple, preferring an exact divisor of M."""
    tm = min(M, max_rows)
    if n_bh < min_steps:                               # guarantee megacore work
        want_m = -(-min_steps // n_bh)                 # ceil
        tm = min(tm, -(-M // want_m))
    if tm < M:
        if tm >= sub and tm % sub != 0:
            tm = (tm // sub) * sub
        if M % tm != 0:                                # avoid a ragged tail block
            step = sub if tm % sub == 0 else 1
            cand, lo = tm, max(step, tm // 2)
            while cand >= lo:
                if M % cand == 0:
                    tm = cand
                    break
                cand -= step
    return max(1, tm)


def multi_head_rmsnorm(x, gamma, *, vmem_budget_bytes=12 * 1024 * 1024,
                       min_grid_steps=8):
    """x: (B, H, N, D); gamma: (H, D).  Returns (B, H, N, D) in x.dtype."""
    B, H, N, D = x.shape
    assert gamma.shape == (H, D), gamma.shape
    orig_n = N

    # Elementwise compute dtype for the two big multiplies: bf16 I/O computes
    # in bf16 (half the VALU ops / vreg pressure on v6e/v7x); everything else
    # stays f32.  Sum-of-squares and rsqrt are always f32.
    # TODO(synk): on v5e (no bf16 VALU) prefer f32 compute even for bf16 I/O.
    compute_dtype = jnp.bfloat16 if x.dtype == jnp.bfloat16 else jnp.float32

    scale = math.sqrt(D)
    eps = 1e-12

    # ---- lane packing for D < 128 (lane-dense loads/stores) ------------------
    pack = 1
    if D < 128 and 128 % D == 0:
        pack = 128 // D
        if N % pack != 0:
            # Zero-pad N up to a pack multiple (padded rows normalize to 0 and
            # are sliced off) so the whole tensor keeps lane-dense stores.
            x = jnp.pad(x, ((0, 0), (0, 0), (0, pack - N % pack), (0, 0)))
            N = x.shape[2]
    # TODO(synk): D < 128 with 128 % D != 0 still takes the masked partial-store
    # path (L = D lanes); a cross-head packing layout would be needed there.

    L = pack * D
    M = N // pack
    x_in = x.reshape(B, H, M, L) if pack > 1 else x    # free row-major merge

    # gamma: tile across packed segments, fold sqrt(D) + compute-dtype cast in
    # here once (removes a per-grid-step L-wide cast+mul inside the kernel).
    g = jnp.tile(gamma, (1, pack)) if pack > 1 else gamma
    g_in = (g.astype(jnp.float32) * scale).astype(compute_dtype).reshape(H, 1, L)

    # ---- tile sizing: budget counts ALL live bytes, not just input bytes -----
    io = x.dtype.itemsize
    cio = np.dtype(compute_dtype).itemsize
    sub = 8 if io >= 4 else (16 if io == 2 else 32)    # dtype-native sublane mult.
    # per tile-row: double-buffered input + output blocks, plus ~2 f32 and one
    # compute-dtype full-width in-kernel temporaries.
    live_per_row = (2 * io + 2 * io + 2 * 4 + cio) * L
    max_rows = max(sub, (vmem_budget_bytes // live_per_row) // sub * sub)
    tm = _pick_tm(M, max_rows, sub, B * H, min_grid_steps)
    grid_m = pl.cdiv(M, tm)

    use_mxu = pack > 1
    kernel = functools.partial(
        _kernel_segsum_mxu if use_mxu else _kernel_rowsum, eps2=eps * eps)

    in_specs = [
        pl.BlockSpec((1, 1, tm, L), lambda b, h, m: (b, h, m, 0)),
        pl.BlockSpec((1, 1, L), lambda b, h, m: (h, 0, 0)),
    ]
    operands = [x_in, g_in]
    if use_mxu:
        lane = np.arange(L)
        a_seg = jnp.asarray(                           # (L, L) block-diag ones, 64 KiB
            (lane[:, None] // D == lane[None, :] // D).astype(np.float32))
        in_specs.append(pl.BlockSpec((L, L), lambda b, h, m: (0, 0)))  # DMA'd once
        operands.append(a_seg)

    live_bytes = (live_per_row * tm
                  + (L * L * 4 if use_mxu else 0)      # segment-sum matrix
                  + 4 * L * 4)                         # gamma block + slack
    vmem_limit = int(min(48 * 1024 * 1024,
                         max(16 * 1024 * 1024, live_bytes + live_bytes // 2)))

    out = pl.pallas_call(
        kernel,
        out_shape=jax.ShapeDtypeStruct((B, H, M, L), x.dtype),
        grid_spec=pltpu.PrefetchScalarGridSpec(
            num_scalar_prefetch=0,
            grid=(B, H, grid_m),
            in_specs=in_specs,
            out_specs=pl.BlockSpec((1, 1, tm, L), lambda b, h, m: (b, h, m, 0)),
        ),
        compiler_params=pltpu.CompilerParams(
            dimension_semantics=("parallel", "parallel", "parallel"),
            vmem_limit_bytes=vmem_limit,
        ),
    )(*operands)

    out = out.reshape(B, H, N, D) if pack > 1 else out
    if N != orig_n:
        out = out[:, :, :orig_n, :]
    return out


# ----------------------------- reference & tests ------------------------------


def _reference(x, gamma):
    """Pure-JAX reference of the PyTorch forward (f32 math)."""
    D = x.shape[-1]
    xf = x.astype(jnp.float32)
    norm = jnp.sqrt(jnp.sum(xf * xf, axis=-1, keepdims=True))
    normed = xf / jnp.maximum(norm, 1e-12)
    return normed * gamma.astype(jnp.float32)[None, :, None, :] * math.sqrt(D)


if __name__ == "__main__":
    key = jax.random.PRNGKey(0)

    def check(B, H, N, D, k, dtype=jnp.float32, atol=1e-5, rtol=1e-5):
        kx, kg = jax.random.split(k)
        x = jax.random.normal(kx, (B, H, N, D), dtype=jnp.float32).astype(dtype)
        # Module init is gamma = ones(heads, 1, dim); perturb so the gamma
        # multiply is actually exercised.
        gamma = jnp.ones((H, D), jnp.float32) + 0.01 * jax.random.normal(
            kg, (H, D), dtype=jnp.float32)
        out = jax.block_until_ready(multi_head_rmsnorm(x, gamma))
        assert out.shape == (B, H, N, D), out.shape
        assert out.dtype == jnp.dtype(dtype), out.dtype
        ref = _reference(x, gamma)
        err = float(jnp.max(jnp.abs(out.astype(jnp.float32) - ref)))
        bound = atol + rtol * float(jnp.max(jnp.abs(ref)))
        assert err <= bound, (err, bound)

    k0, k1, k2, k3 = jax.random.split(key, 4)
    check(2, 4, 8, 32, k0)                    # packed D=32 (pack=4): MXU segment-sum
    check(1, 2, 16, 128, k1)                  # D=128: pack=1, row-sum path
    check(1, 2, 6, 32, k2)                    # ragged N: padded to a pack multiple
    check(2, 2, 16, 64, k3, dtype=jnp.bfloat16, atol=5e-2, rtol=5e-2)  # bf16 I/O
    print("KERNEL_OK")
</pallas_src>

<mosaic_0001>
module attributes {stable_mosaic.version = 11 : i64} {
  func.func @_kernel_segsum_mxu(%arg0: i32, %arg1: i32, %arg2: i32, %arg3: memref<1x1x2x128xf32, #tpu.memory_space<vmem>>, %arg4: memref<1x1x128xf32, #tpu.memory_space<vmem>>, %arg5: memref<128x128xf32, #tpu.memory_space<vmem>>, %arg6: memref<1x1x2x128xf32, #tpu.memory_space<vmem>>) attributes {dimension_semantics = [#tpu.dimension_semantics<parallel>, #tpu.dimension_semantics<parallel>, #tpu.dimension_semantics<parallel>], iteration_bounds = array<i64: 2, 4, 1>, scalar_prefetch = 0 : i64, scratch_operands = 0 : i64, tpu.core_type = #tpu.core_type<tc>, window_params = [{transform_indices = @transform_0, window_bounds = array<i64: 1, 1, 2, 128>}, {transform_indices = @transform_1, window_bounds = array<i64: 1, 1, 128>}, {pipeline_mode = #tpu.pipeline_mode<synchronous>, transform_indices = @transform_2, window_bounds = array<i64: 128, 128>}, {transform_indices = @transform_3, window_bounds = array<i64: 1, 1, 2, 128>}]} {
    %c0 = arith.constant 0 : index
    %c0_0 = arith.constant 0 : index
    %c0_1 = arith.constant 0 : index
    %c0_2 = arith.constant 0 : index
    %0 = vector.load %arg3[%c0, %c0_0, %c0_1, %c0_2] : memref<1x1x2x128xf32, #tpu.memory_space<vmem>>, vector<1x1x2x128xf32>
    %1 = vector.shape_cast %0 : vector<1x1x2x128xf32> to vector<2x128xf32>
    %2 = arith.mulf %1, %1 : vector<2x128xf32>
    %c0_3 = arith.constant 0 : index
    %c0_4 = arith.constant 0 : index
    %3 = vector.load %arg5[%c0_3, %c0_4] : memref<128x128xf32, #tpu.memory_space<vmem>>, vector<128x128xf32>
    %cst = arith.constant dense<0.000000e+00> : vector<2x128xf32>
    %4 = tpu.matmul %2, %3, %cst {dimension_numbers = #tpu.dot_dimension_numbers<[1], [0], [0], [1], [0, 0, 1, 1], [], []>, precision = #tpu.contract_precision<fp32>} : vector<2x128xf32>, vector<128x128xf32>, vector<2x128xf32> -> vector<2x128xf32>
    %cst_5 = arith.constant 1.000000e-24 : f32
    %5 = vector.broadcast %cst_5 : f32 to vector<2x128xf32>
    %6 = arith.maximumf %4, %5 : vector<2x128xf32>
    %7 = math.rsqrt %6 : vector<2x128xf32>
    %c0_6 = arith.constant 0 : index
    %c0_7 = arith.constant 0 : index
    %c0_8 = arith.constant 0 : index
    %8 = vector.load %arg4[%c0_6, %c0_7, %c0_8] : memref<1x1x128xf32, #tpu.memory_space<vmem>>, vector<1x1x128xf32>
    %9 = vector.shape_cast %8 : vector<1x1x128xf32> to vector<128xf32>
    %c0_9 = arith.constant 0 : index
    %c0_10 = arith.constant 0 : index
    %c0_11 = arith.constant 0 : index
    %c0_12 = arith.constant 0 : index
    %10 = vector.load %arg3[%c0_9, %c0_10, %c0_11, %c0_12] : memref<1x1x2x128xf32, #tpu.memory_space<vmem>>, vector<1x1x2x128xf32>
    %11 = vector.shape_cast %10 : vector<1x1x2x128xf32> to vector<2x128xf32>
    %12 = arith.mulf %11, %7 : vector<2x128xf32>
    %13 = vector.shape_cast %9 : vector<128xf32> to vector<1x128xf32>
    %14 = vector.broadcast %13 : vector<1x128xf32> to vector<2x128xf32>
    %15 = arith.mulf %12, %14 : vector<2x128xf32>
    %c0_13 = arith.constant 0 : index
    %c0_14 = arith.constant 0 : index
    %c0_15 = arith.constant 0 : index
    %c0_16 = arith.constant 0 : index
    %16 = vector.load %arg6[%c0_13, %c0_14, %c0_15, %c0_16] : memref<1x1x2x128xf32, #tpu.memory_space<vmem>>, vector<1x1x2x128xf32>
    %17 = vector.shape_cast %16 : vector<1x1x2x128xf32> to vector<2x128xf32>
    %18 = vector.shape_cast %15 : vector<2x128xf32> to vector<1x1x2x128xf32>
    tpu.vector_store %arg6[%c0_13, %c0_14, %c0_15, %c0_16], %18 {strides = array<i32>} : memref<1x1x2x128xf32, #tpu.memory_space<vmem>>, vector<1x1x2x128xf32>,
    return
  }
  func.func @transform_0(%arg0: i32, %arg1: i32, %arg2: i32) -> (i32, i32, i32, i32) {
    %c0_i32 = arith.constant 0 : i32
    %c0_i32_0 = arith.constant 0 : i32
    return %arg0, %arg1, %arg2, %c0_i32 : i32, i32, i32, i32
  }
  func.func @transform_1(%arg0: i32, %arg1: i32, %arg2: i32) -> (i32, i32, i32) {
    %c0_i32 = arith.constant 0 : i32
    %c0_i32_0 = arith.constant 0 : i32
    %c0_i32_1 = arith.constant 0 : i32
    return %arg1, %c0_i32, %c0_i32_0 : i32, i32, i32
  }
  func.func @transform_2(%arg0: i32, %arg1: i32, %arg2: i32) -> (i32, i32) {
    %c0_i32 = arith.constant 0 : i32
    %c0_i32_0 = arith.constant 0 : i32
    %c0_i32_1 = arith.constant 0 : i32
    return %c0_i32, %c0_i32_0 : i32, i32
  }
  func.func @transform_3(%arg0: i32, %arg1: i32, %arg2: i32) -> (i32, i32, i32, i32) {
    %c0_i32 = arith.constant 0 : i32
    %c0_i32_0 = arith.constant 0 : i32
    return %arg0, %arg1, %arg2, %c0_i32 : i32, i32, i32, i32
  }
}

</mosaic_0001>

<bundles_post_ra>
// kernel: tpu_custom_call.1
= control target key start
LH: loop header
LB: loop body
LE: loop exit
PB: predicated region body
PF: predicated region fallthrough
CT: control target
= control target key end

     0   :  { %s2391_s0 = inlined_call_operand.hbm [shape: f32[2,4,2,128], index: 0, kind: input, shape index: {}]   ;;  %s2392_s1 = inlined_call_operand.hbm [shape: f32[4,1,128], index: 1, kind: input, shape index: {}]   ;;  %s2393_s2 = inlined_call_operand.hbm [shape: f32[128,128], index: 2, kind: input, shape index: {}]   ;;  %s2394_s3 = inlined_call_operand.hbm [shape: f32[2,4,2,128], index: 3, kind: output, shape index: {}]  }
   0x1   :  { %2404 = sst [smem:[#allocation18_spill]] %s2393_s2 }
   0x2   :  { %2405 = sst [smem:[#allocation19_spill]] %s2394_s3 }
   0x3   :  { %8 = vsyncpa [#allocation3], 0 }
   0x4   :  { %10 = vsyncpa [#allocation3 + $0x1], 0 }
   0x5   :  { %11 = vsyncpa [#allocation6], 0 }
   0x6   :  { %13 = vsyncpa [#allocation6 + $0x1], 0 }
   0x7   :  { %14 = vsyncpa [#allocation4], 0 }
   0x8   :  { %16 = vsyncpa [#allocation4 + $0x1], 0  ;;  %s1766_s12 = smov 0   ;;  %s1768_s13 = smov 0  }
   0x9   :  { %s1770_s14 = smov 0   ;;  %s1772_s15 = smov 0  }
   0xa   :  { %s1774_s16 = smov 0   ;;  %s1776_s17 = smov 0  }
   0xb   :  { %s1778_s18 = smov 0   ;;  %s1780_s19 = smov 0  }
   0xc   :  { %s1782_s20 = smov 0   ;;  %s1784_s21 = smov 0  }
   0xd   :  { %s1786_s22 = smov 0  }
   0xe LB: > { %2406 = sst [smem:[#allocation13_spill]] %s1708_s15  ;;  %s1822_s23 = sadd.s32 4294967295, %s1736_s22   ;;  %s1736_s22 = sphi %s1786_s22, %s22_s22   ;;  %s1732_s21 = sphi %s1784_s21, %s2443_s21   ;;  %s1728_s20 = sphi %s1782_s20, %s2442_s20   ;;  %s1724_s19 = sphi %s1780_s19, %s2441_s19   ;;  %s1720_s18 = sphi %s1778_s18, %s2440_s18   ;;  %s1716_s17 = sphi %s1776_s17, %s2439_s17   ;;  %s1712_s16 = sphi %s1774_s16, %s2438_s16   ;;  %s1708_s15 = sphi %s1772_s15, %s2437_s15   ;;  %s1704_s14 = sphi %s1770_s14, %s2436_s14   ;;  %s1700_s13 = sphi %s1768_s13, %s2435_s13   ;;  %s1696_s12 = sphi %s1766_s12, %s2434_s12  }
   0xf   : > { %2407 = sst [smem:[#allocation14_spill]] %s1720_s18  ;;  %p1073_p0 = scmp.ge.s32.totalorder %s1736_s22, 1 }
  0x10   : > { %p2402_p1 = scmp.eq.s32.totalorder %s1822_s23, 0  ;;  %p153_p2 = scmp.lt.s32.totalorder %s1736_s22, 9 }
  0x11   : > { %s1738_s25 = smov [#allocation7]  }
  0x12   : > { %p1827_p3 = pnand %p1073_p0, %p153_p2  ;;  %s165_s26 = sshll.u32 %s1738_s25, 4  ;;  %s166_s26 = int_to_ptr.vmem [resolvable:$true] %s165_s26 }
  0x13   : > { %s1537_s27 = scalar_lea.vmem %s166_s26, 2048  ;;  %p1545_p10 = scmp.lt.s32.totalorder %s166_s26, %s166_s26 }
  0x14   : > { %p1412_p4 = pneg %p1827_p3  ;;  %p1538_p7 = scmp.ne.s32.totalorder %s166_s26, %s1537_s27 }
  0x15   : > { %p1546_p11 = scmp.lt.s32.totalorder %s1537_s27, %s1537_s27 }
  0x16   : > { %p1413_p5 = pnand %p1412_p4, %p2402_p1 }
  0x17   : > { %p1547_p12 = por %p1546_p11, %p1545_p10 }
  0x18   : > { %p1528_p6 = pneg %p1413_p5 }
  0x1a   : > { %p1540_p8 = pnand %p1538_p7, %p1528_p6 }
  0x1c   : > { %p1541_p9 = pneg %p1540_p8 }
  0x1e   : > { %p1548_p13 = pnand %p1547_p12, %p1541_p9 }
  0x20   : > { %1551 = shalt.err (!%p1548_p13)
}
  0x21   : > { %s1739_s28 = smov 128   ;;  %s1740_s29 = smov 8  }
  0x22   : > { %s2409_s2 = sld [smem:[#allocation18_spill]]  ;;  %s1072_s5 = sadd.s32 4294967294, %s1736_s22  }
  0x23   : > { %s37_s6 = sadd.s32 1, %s1728_s20  ;;  %s41_s7 = sadd.s32 1, %s1732_s21 }
  0x24   : > { %p39_p0 = scmp.ge.s32.totalorder %s37_s6, 4  ;;  %s52_s8 = sadd.s32 1, %s1716_s17 }
  0x25   : > { %p59_p2 = scmp.ne.s32.totalorder %s1716_s17, %s1712_s16  ;;  %p2395_p4 = scmp.eq.s32.totalorder %s1736_s22, 0 }
  0x26   : > { %s2445_s6 = smov (%p39_p0, %s37_s6), 0  ;;  %s2447_s7 = smov (!%p39_p0, %s41_s7), %s1732_s21 }
  0x27   : > { %2410 = sst [smem:[#allocation15_spill]] %s2445_s6  ;;  %s1850_s9 = ssub.s32 %s1728_s20, %s2445_s6 }
  0x28   : > { %1415 = dma.hbm_to_vmem [thread:$0]  (!%p1413_p5), %s2409_s2, 2048, %s166_s26, [#allocation6], %s1739_s28, %s1739_s28, %s1740_s29  }
  0x29   : > { %p1854_p5 = por %p2395_p4, %p59_p2  ;;  %p43_p6 = scmp.ge.s32.totalorder %s2447_s7, 2 }
  0x2a   : > { %p65_p7 = scmp.ne.s32.totalorder %s1712_s16, %s1708_s15  ;;  %p140_p9 = scmp.eq.s32.totalorder %s1822_s23, 7 }
  0x2b   : > { %s2449_s7 = smov (%p43_p6, %s2447_s7), 0  ;;  %p146_p12 = scmp.eq.s32.totalorder %s1072_s5, 7 }
  0x2c   : > { %2412 = sst [smem:[#allocation16_spill]] %s2449_s7  ;;  %p1866_p10 = por %p2402_p1, %p65_p7 }
  0x2d   : > { %p1870_p11 = por %p140_p9, %p59_p2  ;;  %s45_s26 = ssub.s32 %s1732_s21, %s2449_s7 }
  0x2e   : > { %s47_s27 = sor.u32 %s1850_s9, %s45_s26  ;;  %p1428_p13 = scmp.lt.s32.totalorder %s1736_s22, 8 }
  0x2f   : > { %s2414_s25 = scalar_select %p1870_p11, 1, 0 }
  0x30   : > { %p50_p0 = scmp.eq.s32.totalorder %s47_s27, 0  ;;  %p1878_p4 = por %p146_p12, %p65_p7 }
  0x31   : > { %2415 = sst [smem:[#allocation17_spill]] %s2414_s25  ;;  %s179_s29 = sand.u32 1, %s1716_s17  }
  0x32   : > { %s2416_s28 = scalar_select %p1878_p4, 1, 0 }
  0x33   : > { %s1077_s30 = sshll.u32 %s1732_s21, 2  ;;  %s1076_s2 = sshll.u32 %s179_s29, 1 }
  0x34   : > { %s1885_s4 = scalar_select %p50_p0, %s1716_s17, %s52_s8  }
  0x35   : > { %s189_s6 = sadd.s32 %s1728_s20, %s1077_s30  ;;  %s183_s3 = scalar_lea.vmem [#allocation2], %s1076_s2 }
  0x36   : > { %s1078_s15 = sshll.u32 %s189_s6, 5  ;;  %s193_s25 = sshll.u32 %s183_s3, 4  ;;  %s194_s25 = int_to_ptr.vmem [resolvable:$true] %s193_s25 }
  0x37   : > { %s191_s5 = scalar_lea.hbm %s2391_s0, %s1078_s15  ;;  %p1895_p2 = pnand %p1428_p13, %p1854_p5 }
  0x38   : > { %s180_s27 = scalar_lea.sflag [#allocation3], %s179_s29  ;;  %s1565_s8 = scalar_lea.vmem %s194_s25, 32 }
  0x39   : > { %p1554_p6 = pneg %p1895_p2  ;;  %p1566_p7 = scmp.ne.s32.totalorder %s194_s25, %s1565_s8 }
  0x3a   : > { %s1741_s2 = smov [#allocation2]  }
  0x3b   : > { %p1568_p9 = pnand %p1566_p7, %p1554_p6  ;;  %s1570_s3 = sshll.u32 %s1741_s2, 4  ;;  %s1571_s3 = int_to_ptr.vmem [resolvable:$false] %s1570_s3 }
  0x3c   : > { %s1572_s18 = scalar_lea.vmem %s1571_s3, 64  ;;  %p1573_p0 = scmp.lt.s32.totalorder %s194_s25, %s1571_s3 }
  0x3d   : > { %p1569_p12 = pneg %p1568_p9  ;;  %p1574_p1 = scmp.lt.s32.totalorder %s1572_s18, %s1565_s8 }
  0x3f   : > { %p1575_p8 = por %p1574_p1, %p1573_p0 }
  0x41   : > { %p1576_p4 = pnand %p1575_p8, %p1569_p12 }
  0x43   : > { %1579 = shalt.err (!%p1576_p4)
}
  0x44   : > { %1419 = dma.hbm_to_vmem [thread:$0]  (!%p1895_p2), %s191_s5, 32, %s194_s25, %s180_s27  }
  0x45   : > { %s78_s15 = sadd.s32 1, %s1704_s14  ;;  %p85_p1 = scmp.ne.s32.totalorder %s1704_s14, %s1700_s13 }
  0x46   : > { %p2418_p5 = scmp.eq.s32.totalorder %s1850_s9, 0  ;;  %p2419_p4 = scmp.eq.s32.totalorder %s1736_s22, 0 }
  0x47   : > { %p91_p6 = scmp.ne.s32.totalorder %s1700_s13, %s1696_s12  ;;  %s200_s7 = sand.u32 1, %s1736_s22  }
  0x48   : > { %s1909_s6 = scalar_select %p2418_p5, %s1704_s14, %s78_s15  }
  0x49   : > { %p87_p8 = por %p85_p1, %p2419_p4  ;;  %s202_s10 = sand.u32 1, %s1704_s14  }
  0x4a   : > { %p2420_p7 = scmp.eq.s32.totalorder %s1822_s23, 0  ;;  %s1079_s30 = sshll.u32 %s1728_s20, 4 }
  0x4b   : > { %s208_s25 = scalar_lea.hbm %s2392_s1, %s1079_s30  ;;  %s203_s5 = scalar_lea.vmem [#allocation5], %s202_s10 }
  0x4c   : > { %p1919_p9 = por %p91_p6, %p2420_p7  ;;  %s210_s27 = sshll.u32 %s203_s5, 4  ;;  %s211_s27 = int_to_ptr.vmem [resolvable:$true] %s210_s27 }
  0x4d   : > { %p1929_p2 = pnand %p1428_p13, %p87_p8  ;;  %s201_s12 = scalar_lea.sflag [#allocation6], %s200_s7 }
  0x4e   : > { %s1593_s2 = scalar_lea.vmem %s211_s27, 16  ;;  %s1742_s3 = smov [#allocation5]  }
  0x4f   : > { %p1582_p12 = pneg %p1929_p2  ;;  %p1594_p0 = scmp.ne.s32.totalorder %s211_s27, %s1593_s2 }
  0x50   : > { %s1598_s18 = sshll.u32 %s1742_s3, 4  ;;  %s1599_s18 = int_to_ptr.vmem [resolvable:$false] %s1598_s18 }
  0x51   : > { %p1596_p1 = pnand %p1594_p0, %p1582_p12  ;;  %s1600_s15 = scalar_lea.vmem %s1599_s18, 32 }
  0x52   : > { %p1601_p4 = scmp.lt.s32.totalorder %s211_s27, %s1599_s18  ;;  %p1602_p6 = scmp.lt.s32.totalorder %s1600_s15, %s1593_s2 }
  0x53   : > { %p1597_p5 = pneg %p1596_p1 }
  0x54   : > { %p1603_p7 = por %p1602_p6, %p1601_p4 }
  0x56   : > { %p1604_p11 = pnand %p1603_p7, %p1597_p5 }
  0x58   : > { %1607 = shalt.err (!%p1604_p11)
}
  0x59   : > { %1422 = dma.hbm_to_vmem [thread:$0]  (!%p1929_p2), %s208_s25, 16, %s211_s27, %s201_s12  }
  0x5a   : > { %219 = sbr.rel (%p1827_p3) target bundleno = 440 (0x1b8), region = 32  ;;  %s1940_s7 = sand.u32 (!%p1827_p3), 1, %s1712_s16  }
  0x5b   : > { %s1081_s10 = sshll.u32 (!%p1827_p3), %s1940_s7, 1  ;;  %s222_s30 = scalar_lea.sflag (!%p1827_p3), [#allocation3], %s1940_s7 }
  0x5c   : > { %s1946_s26 = scalar_lea.vmem (!%p1827_p3), [#allocation2], %s1081_s10 }
  0x5f   : > { %1679 = dma.done.wait (%p1866_p10), %s222_s30, 32  }
  0x60   : > { %1681 = vsyncadd (%p1866_p10), %s222_s30, 4294967264  ;;  %s230_s24 = sand.u32 1, %s1822_s23   ;;  %s232_s8 = sand.u32 1, %s1700_s13  }
  0x61   : > { %s231_s25 = scalar_lea.sflag [#allocation6], %s230_s24  ;;  %s1954_s5 = scalar_lea.vmem [#allocation5], %s232_s8 }
  0x62   : > { %1683 = dma.done.wait (%p1919_p9), %s231_s25, 16  }
  0x63   : > { %1685 = vsyncadd (%p1919_p9), %s231_s25, 4294967280  ;;  %p2423_p3 = scmp.eq.s32.totalorder %s1822_s23, 0 }
  0x65   : > { %1687 = dma.done.wait (%p2423_p3), [#allocation6], 2048   ;;  %p2424_p11 = pmov %p2423_p3 }
  0x66   : > { %v1743_v0 = vmov 0.0   ;;  %vm1744_vm0 = vmmov 0   ;;  %v281_v1 = vld [vmem:[#allocation7 + $0x78] sm:$0xff]  ;;  %v280_v2 = vld [vmem:[#allocation7 + $0x70] sm:$0xff]  ;;  %v279_v3 = vld [vmem:[#allocation7 + $0x68] sm:$0xff]  ;;  %s2425_s23 = sld [smem:[#allocation14_spill]] }
  0x67   : > { %1689 = vsyncadd (%p2424_p11), [#allocation6], 4294965248  ;;  %1192 = vmatprep.subr.mxu0 %v1743_v0  ;;  %1227 = vmatprep.subr.mxu1 %v1743_v0  ;;  %v1970_v4 = vand.u32 4294901760, %v281_v1  ;;  %v1972_v5 = vand.u32 4294901760, %v280_v2  ;;  %v1974_v6 = vand.u32 4294901760, %v279_v3  ;;  %v278_v7 = vld [vmem:[#allocation7 + $0x60] sm:$0xff] }
  0x68   : > { %1224 = vmatprep.mubr.msk.f32.mxu0 %vm1744_vm0, %v1743_v0  ;;  %1259 = vmatprep.mubr.msk.f32.mxu1 %vm1744_vm0, %v1743_v0  ;;  %v277_v8 = vld [vmem:[#allocation7 + $0x58] sm:$0xff]  ;;  %v276_v9 = vld [vmem:[#allocation7 + $0x50] sm:$0xff]  ;;  %v1976_v10 = vand.u32 4294901760, %v278_v7  ;;  %v275_v13 = vld [vmem:[#allocation7 + $0x48] sm:$0xff]  ;;  %s2426_s11 = sld [smem:[#allocation17_spill]]  ;;  %s1086_s29 = sshll.u32 %s1724_s19, 2 }
  0x69   : > { %v1978_v11 = vand.u32 4294901760, %v277_v8  ;;  %v1980_v12 = vand.u32 4294901760, %v276_v9  ;;  %v274_v14 = vld [vmem:[#allocation7 + $0x40] sm:$0xff]  ;;  %1193 = vmatpush3.msra.mxu0 %v1970_v4  ;;  %v1984_v15 = vsub.f32 %v281_v1, %v1970_v4  ;;  %v1987_v16 = vsub.f32 %v280_v2, %v1972_v5  ;;  %v273_v19 = vld [vmem:[#allocation7 + $0x38] sm:$0xff]  ;;  %v272_v26 = vld [vmem:[#allocation7 + $0x30] sm:$0xff]  ;;  %s263_s12 = scalar_lea.vmem [#allocation8], %s1081_s10 }
  0x6a   : > { %v1989_v17 = vand.u32 4294901760, %v275_v13  ;;  %v1992_v18 = vsub.f32 %v279_v3, %v1974_v6  ;;  %1194 = vmatprep.subr.mxu0 %v1743_v0  ;;  %v1996_v20 = vsub.f32 %v278_v7, %v1976_v10  ;;  %v2005_v25 = vand.u32 4294901760, %v274_v14  ;;  %v271_v34 = vld [vmem:[#allocation7 + $0x28] sm:$0xff]  ;;  %v270_v41 = vld [vmem:[#allocation7 + $0x20] sm:$0xff]  ;;  %v2051_v48 = vld [vmem:[%s1946_s26] sm:$0x3] }
  0x6b   : > { %v1999_v21 = vsub.f32 %v277_v8, %v1978_v11  ;;  %1195 = vmatpush3.msra.mxu0 %v1972_v5  ;;  %v376_v22 = vand.u32 4294901760, %v1984_v15  ;;  %v383_v23 = vand.u32 4294901760, %v1987_v16  ;;  %v2009_v28 = vand.u32 4294901760, %v273_v19  ;;  %v269_v50 = vld [vmem:[#allocation7 + $0x18] sm:$0xff]  ;;  %v268_v54 = vld [vmem:[#allocation7 + $0x10] sm:$0xff]  ;;  %v267_v61 = vld [vmem:[#allocation7 + $0x8] sm:$0xff] }
  0x6c   : > { %v390_v24 = vand.u32 4294901760, %v1992_v18  ;;  %1196 = vmatprep.subr.mxu0 %v1743_v0  ;;  %v397_v27 = vand.u32 4294901760, %v1996_v20  ;;  %v2013_v30 = vsub.f32 %v276_v9, %v1980_v12  ;;  %v2026_v35 = vsub.f32 %v275_v13, %v1989_v17  ;;  %v266_v8 = vld [vmem:[#allocation7] sm:$0xff]  ;;  %s948_s27 = sadd.s32 %s2425_s23, %s1086_s29  ;;  %s952_s2 = sshll.u32 %s263_s12, 4  ;;  %s953_s2 = int_to_ptr.vmem [resolvable:$true] %s952_s2 }
  0x6d   : > { %v404_v29 = vand.u32 4294901760, %v1999_v21  ;;  %1197 = vmatpush3.msra.mxu0 %v1974_v6  ;;  %v377_v31 = vsub.f32 %v1984_v15, %v376_v22  ;;  %v384_v32 = vsub.f32 %v1987_v16, %v383_v23  ;;  %v2029_v36 = vand.u32 4294901760, %v272_v26  ;;  %s1087_s9 = sshll.u32 %s948_s27, 5  ;;  %s2427_s15 = sld [smem:[#allocation19_spill]] }
  0x6e   : > { %v391_v33 = vsub.f32 %v1992_v18, %v390_v24  ;;  %1198 = vmatprep.subr.mxu0 %v1743_v0  ;;  %v398_v39 = vsub.f32 %v1996_v20, %v397_v27  ;;  %v411_v40 = vand.u32 4294901760, %v2013_v30  ;;  %v2037_v42 = vand.u32 4294901760, %v271_v34  ;;  %s936_s24 = scalar_lea.sflag [#allocation4], %s1940_s7  ;;  %s1608_s8 = scalar_lea.vmem %s953_s2, 32 }
  0x6f   : > { %1199 = vmatpush3.msra.mxu0 %v1976_v10  ;;  %v378_v37 = vand.u32 4294901760, %v377_v31  ;;  %v385_v38 = vand.u32 4294901760, %v384_v32  ;;  %v2040_v43 = vsub.f32 %v274_v14, %v2005_v25  ;;  %v405_v45 = vsub.f32 %v1999_v21, %v404_v29  ;;  %p1609_p10 = scmp.ne.s32.totalorder %s953_s2, %s1608_s8  ;;  %p2429_p13 = scmp.ne.s32.totalorder %s2426_s11, 0 }
  0x70   : > { %1200 = vmatprep.subr.mxu0 %v1743_v0  ;;  %v392_v44 = vand.u32 4294901760, %v391_v33  ;;  %v418_v46 = vand.u32 4294901760, %v2026_v35  ;;  %v2048_v47 = vsub.f32 %v273_v19, %v2009_v28  ;;  %v2055_v49 = vand.u32 4294901760, %v270_v41  ;;  %s1745_s19 = smov [#allocation8]  }
  0x71   : > { %1201 = vmatpush3.msra.mxu0 %v1978_v11  ;;  %1228 = vmatpush3.msra.mxu1 %v378_v37  ;;  %v399_v51 = vand.u32 4294901760, %v398_v39  ;;  %v412_v52 = vsub.f32 %v2013_v30, %v411_v40  ;;  %v425_v53 = vand.u32 4294901760, %v2040_v43  ;;  %v2063_v55 = vsub.f32 %v272_v26, %v2029_v36  ;;  %p1610_p8 = pnand %p1609_p10, %p2429_p13  ;;  %s1612_s25 = sshll.u32 %s1745_s19, 4  ;;  %s1613_s25 = int_to_ptr.vmem [resolvable:$false] %s1612_s25 }
  0x72   : > { %1202 = vmatprep.subr.mxu0 %v1743_v0  ;;  %1229 = vmatprep.subr.mxu1 %v1743_v0  ;;  %v432_v56 = vand.u32 4294901760, %v2048_v47  ;;  %v265_v57 = vmul.f32 %v2051_v48, %v2051_v48  ;;  %v406_v58 = vand.u32 4294901760, %v405_v45  ;;  %v419_v59 = vsub.f32 %v2026_v35, %v418_v46  ;;  %s1614_s10 = scalar_lea.vmem %s1613_s25, 64  ;;  %p1615_p2 = scmp.lt.s32.totalorder %s953_s2, %s1613_s25 }
  0x73   : > { %1203 = vmatpush3.msra.mxu0 %v1980_v12  ;;  %1230 = vmatpush3.msra.mxu1 %v385_v38  ;;  %v2074_v60 = vand.u32 4294901760, %v269_v50  ;;  %v2077_v62 = vsub.f32 %v271_v34, %v2037_v42  ;;  %v2081_v63 = vand.u32 4294901760, %v268_v54  ;;  %v413_v2 = vand.u32 4294901760, %v412_v52  ;;  %s2428_s30 = smov %s2427_s15  ;;  %s950_s26 = scalar_lea.hbm %s2427_s15, %s1087_s9 }
  0x74   : > { %1204 = vmatprep.subr.mxu0 %v1743_v0  ;;  %1231 = vmatprep.subr.mxu1 %v1743_v0  ;;  %v2083_v1 = vand.u32 4294901760, %v265_v57  ;;  %v426_v3 = vsub.f32 %v2040_v43, %v425_v53  ;;  %v439_v7 = vand.u32 4294901760, %v2063_v55  ;;  %v2091_v9 = vsub.f32 %v270_v41, %v2055_v49  ;;  %p1611_p9 = pneg %p1610_p8  ;;  %p1616_p12 = scmp.lt.s32.totalorder %s1614_s10, %s1608_s8 }
  0x75   : > { %1205 = vmatpush3.msra.mxu0 %v1989_v17  ;;  %1232 = vmatpush3.msra.mxu1 %v392_v44  ;;  %v433_v13 = vsub.f32 %v2048_v47, %v432_v56  ;;  %v2098_v14 = vand.u32 4294901760, %v267_v61  ;;  %v420_v19 = vand.u32 4294901760, %v419_v59  ;;  %v446_v26 = vand.u32 4294901760, %v2077_v62 }
  0x76   : > { %1206 = vmatprep.subr.mxu0 %v1743_v0  ;;  %1233 = vmatprep.subr.mxu1 %v1743_v0  ;;  %v2103_v31 = vsub.f32 %v265_v57, %v2083_v1  ;;  %v2106_v32 = vsub.f32 %v269_v50, %v2074_v60  ;;  %v2110_v33 = vand.u32 4294901760, %v266_v8  ;;  %v427_v34 = vand.u32 4294901760, %v426_v3  ;;  %p1617_p0 = por %p1616_p12, %p1615_p2 }
  0x77   : > { %1207 = vmatpush3.msra.mxu0 %v2005_v25  ;;  %1234 = vmatpush3.msra.mxu1 %v399_v51  ;;  %v440_v37 = vsub.f32 %v2063_v55, %v439_v7  ;;  %v453_v38 = vand.u32 4294901760, %v2091_v9  ;;  %v2118_v39 = vsub.f32 %v268_v54, %v2081_v63  ;;  %v434_v41 = vand.u32 4294901760, %v433_v13 }
  0x78   : > { %1208 = vmatprep.subr.mxu0 %v1743_v0  ;;  %1235 = vmatprep.subr.mxu1 %v1743_v0  ;;  %v447_v44 = vsub.f32 %v2077_v62, %v446_v26  ;;  %v365_v45 = vand.u32 4294901760, %v2103_v31  ;;  %v460_v50 = vand.u32 4294901760, %v2106_v32  ;;  %v2129_v51 = vsub.f32 %v267_v61, %v2098_v14  ;;  %p1618_p1 = pnand %p1617_p0, %p1611_p9 }
  0x79   : > { %1209 = vmatpush3.msra.mxu0 %v2009_v28  ;;  %1236 = vmatpush3.msra.mxu1 %v406_v58  ;;  %v441_v52 = vand.u32 4294901760, %v440_v37  ;;  %v454_v54 = vsub.f32 %v2091_v9, %v453_v38  ;;  %v467_v57 = vand.u32 4294901760, %v2118_v39  ;;  %v2139_v58 = vsub.f32 %v266_v8, %v2110_v33 }
  0x7a   : > { %1210 = vmatprep.subr.mxu0 %v1743_v0  ;;  %1237 = vmatprep.subr.mxu1 %v1743_v0  ;;  %v448_v59 = vand.u32 4294901760, %v447_v44  ;;  %v366_v61 = vsub.f32 %v2103_v31, %v365_v45  ;;  %v474_v3 = vand.u32 4294901760, %v2129_v51 }
  0x7b   : > { %1211 = vmatpush3.msra.mxu0 %v2029_v36  ;;  %1238 = vmatpush3.msra.mxu1 %v413_v2  ;;  %v461_v2 = vsub.f32 %v2106_v32, %v460_v50  ;;  %v455_v8 = vand.u32 4294901760, %v454_v54  ;;  %v468_v13 = vsub.f32 %v2118_v39, %v467_v57 }
  0x7c   : > { %1212 = vmatprep.subr.mxu0 %v1743_v0  ;;  %1239 = vmatprep.subr.mxu1 %v1743_v0 }
  0x7d   : > { %1213 = vmatpush3.msra.mxu0 %v2037_v42  ;;  %1240 = vmatpush3.msra.mxu1 %v420_v19  ;;  %v481_v19 = vand.u32 4294901760, %v2139_v58  ;;  %v462_v37 = vand.u32 4294901760, %v461_v2  ;;  %v469_v44 = vand.u32 4294901760, %v468_v13 }
  0x7e   : > { %1214 = vmatprep.subr.mxu0 %v1743_v0  ;;  %1241 = vmatprep.subr.mxu1 %v1743_v0 }
  0x7f   : > { %1215 = vmatpush3.msra.mxu0 %v2055_v49  ;;  %1242 = vmatpush3.msra.mxu1 %v427_v34  ;;  %v367_v34 = vand.u32 4294901760, %v366_v61 }
  0x80   : > { %1216 = vmatprep.subr.mxu0 %v1743_v0  ;;  %1243 = vmatprep.subr.mxu1 %v1743_v0 }
  0x81   : > { %1217 = vmatpush3.msra.mxu0 %v2074_v60  ;;  %1244 = vmatpush3.msra.mxu1 %v434_v41  ;;  %v475_v41 = vsub.f32 %v2129_v51, %v474_v3 }
  0x82   : > { %1218 = vmatprep.subr.mxu0 %v1743_v0  ;;  %1245 = vmatprep.subr.mxu1 %v1743_v0 }
  0x83   : > { %1219 = vmatpush3.msra.mxu0 %v2081_v63  ;;  %1246 = vmatpush3.msra.mxu1 %v441_v52  ;;  %v482_v52 = vsub.f32 %v2139_v58, %v481_v19  ;;  %v476_v54 = vand.u32 4294901760, %v475_v41 }
  0x84   : > { %1220 = vmatprep.subr.mxu0 %v1743_v0  ;;  %1247 = vmatprep.subr.mxu1 %v1743_v0 }
  0x85   : > { %1221 = vmatpush3.msra.mxu0 %v2098_v14  ;;  %1248 = vmatpush3.msra.mxu1 %v448_v59  ;;  %v483_v59 = vand.u32 4294901760, %v482_v52 }
  0x86   : > { %1222 = vmatprep.subr.mxu0 %v1743_v0  ;;  %1249 = vmatprep.subr.mxu1 %v1743_v0 }
  0x87   : > { %1223 = vmatpush3.msra.mxu0 %v2110_v33  ;;  %1250 = vmatpush3.msra.mxu1 %v455_v8 }
  0x88   : > { %1251 = vmatprep.subr.mxu1 %v1743_v0  ;;  %1262 = vmatprep.subr.mxu0 %v1743_v0 }
  0x89   : > { %1225 = vmatmul.mubr.f32.vlgmr.msra.gmra.mxu0 %v367_v34  ;;  %1252 = vmatpush3.msra.mxu1 %v462_v37 }
  0x8a   : > { %1263 = vmatpush3.msra.mxu0 %v1984_v15  ;;  %1253 = vmatprep.subr.mxu1 %v1743_v0 }
  0x8b   : > { %1264 = vmatprep.subr.mxu0 %v1743_v0  ;;  %1254 = vmatpush3.msra.mxu1 %v469_v44 }
  0x8c   : > { %1265 = vmatpush3.msra.mxu0 %v1987_v16  ;;  %1255 = vmatprep.subr.mxu1 %v1743_v0 }
  0x8d   : > { %1266 = vmatprep.subr.mxu0 %v1743_v0  ;;  %1256 = vmatpush3.msra.mxu1 %v476_v54 }
  0x8e   : > { %1267 = vmatpush3.msra.mxu0 %v1992_v18  ;;  %1257 = vmatprep.subr.mxu1 %v1743_v0 }
  0x8f   : > { %1268 = vmatprep.subr.mxu0 %v1743_v0  ;;  %1258 = vmatpush3.msra.mxu1 %v483_v59 }
  0x90   : > { %1269 = vmatpush3.msra.mxu0 %v1996_v20  ;;  %1260 = vmatmul.mubr.f32.vlgmr.msra.gmra.mxu1 %v2083_v1 }
  0x91   : > { %1270 = vmatprep.subr.mxu0 %v1743_v0  ;;  %1297 = vmatprep.subr.mxu1 %v1743_v0 }
  0x92   : > { %1271 = vmatpush3.msra.mxu0 %v1999_v21  ;;  %1298 = vmatpush3.msra.mxu1 %v1970_v4 }
  0x93   : > { %1272 = vmatprep.subr.mxu0 %v1743_v0  ;;  %1299 = vmatprep.subr.mxu1 %v1743_v0 }
  0x94   : > { %1273 = vmatpush3.msra.mxu0 %v2013_v30  ;;  %1300 = vmatpush3.msra.mxu1 %v1972_v5 }
  0x95   : > { %1274 = vmatprep.subr.mxu0 %v1743_v0  ;;  %1301 = vmatprep.subr.mxu1 %v1743_v0 }
  0x96   : > { %1275 = vmatpush3.msra.mxu0 %v2026_v35  ;;  %1302 = vmatpush3.msra.mxu1 %v1974_v6 }
  0x97   : > { %1276 = vmatprep.subr.mxu0 %v1743_v0  ;;  %1303 = vmatprep.subr.mxu1 %v1743_v0 }
  0x98   : > { %1277 = vmatpush3.msra.mxu0 %v2040_v43  ;;  %1304 = vmatpush3.msra.mxu1 %v1976_v10 }
  0x99   : > { %1278 = vmatprep.subr.mxu0 %v1743_v0  ;;  %1305 = vmatprep.subr.mxu1 %v1743_v0 }
  0x9a   : > { %1279 = vmatpush3.msra.mxu0 %v2048_v47  ;;  %1306 = vmatpush3.msra.mxu1 %v1978_v11 }
  0x9b   : > { %1280 = vmatprep.subr.mxu0 %v1743_v0  ;;  %1307 = vmatprep.subr.mxu1 %v1743_v0 }
  0x9c   : > { %1281 = vmatpush3.msra.mxu0 %v2063_v55  ;;  %1308 = vmatpush3.msra.mxu1 %v1980_v12 }
  0x9d   : > { %1282 = vmatprep.subr.mxu0 %v1743_v0  ;;  %1309 = vmatprep.subr.mxu1 %v1743_v0 }
  0x9e   : > { %1283 = vmatpush3.msra.mxu0 %v2077_v62  ;;  %1310 = vmatpush3.msra.mxu1 %v1989_v17 }
  0x9f   : > { %1284 = vmatprep.subr.mxu0 %v1743_v0  ;;  %1311 = vmatprep.subr.mxu1 %v1743_v0 }
  0xa0   : > { %1285 = vmatpush3.msra.mxu0 %v2091_v9  ;;  %1312 = vmatpush3.msra.mxu1 %v2005_v25 }
  0xa1   : > { %1286 = vmatprep.subr.mxu0 %v1743_v0  ;;  %1313 = vmatprep.subr.mxu1 %v1743_v0 }
  0xa2   : > { %1287 = vmatpush3.msra.mxu0 %v2106_v32  ;;  %1314 = vmatpush3.msra.mxu1 %v2009_v28 }
  0xa3   : > { %1288 = vmatprep.subr.mxu0 %v1743_v0  ;;  %1315 = vmatprep.subr.mxu1 %v1743_v0 }
  0xa4   : > { %1289 = vmatpush3.msra.mxu0 %v2118_v39  ;;  %1316 = vmatpush3.msra.mxu1 %v2029_v36 }
  0xa5   : > { %1290 = vmatprep.subr.mxu0 %v1743_v0  ;;  %1317 = vmatprep.subr.mxu1 %v1743_v0 }
  0xa6   : > { %1291 = vmatpush3.msra.mxu0 %v2129_v51  ;;  %1318 = vmatpush3.msra.mxu1 %v2037_v42 }
  0xa7   : > { %1292 = vmatprep.subr.mxu0 %v1743_v0  ;;  %1319 = vmatprep.subr.mxu1 %v1743_v0 }
  0xa8   : > { %1293 = vmatpush3.msra.mxu0 %v2139_v58  ;;  %1294 = vmatprep.mubr.msk.f32.mxu0 %vm1744_vm0, %v1743_v0 }
  0xa9   : > { %1320 = vmatpush3.msra.mxu1 %v2055_v49  ;;  %1295 = vmatmul.mubr.f32.vlgmr.msra.gmra.mxu0 %v2103_v31 }
  0xaa   : > { %1321 = vmatprep.subr.mxu1 %v1743_v0  ;;  %1332 = vmatprep.subr.mxu0 %v1743_v0 }
  0xab   : > { %1322 = vmatpush3.msra.mxu1 %v2074_v60  ;;  %1333 = vmatpush3.msra.mxu0 %v376_v22 }
  0xac   : > { %1323 = vmatprep.subr.mxu1 %v1743_v0  ;;  %1334 = vmatprep.subr.mxu0 %v1743_v0 }
  0xad   : > { %1324 = vmatpush3.msra.mxu1 %v2081_v63  ;;  %1335 = vmatpush3.msra.mxu0 %v383_v23 }
  0xae   : > { %1325 = vmatprep.subr.mxu1 %v1743_v0  ;;  %1336 = vmatprep.subr.mxu0 %v1743_v0 }
  0xaf   : > { %1326 = vmatpush3.msra.mxu1 %v2098_v14  ;;  %1337 = vmatpush3.msra.mxu0 %v390_v24 }
  0xb0   : > { %1327 = vmatprep.subr.mxu1 %v1743_v0  ;;  %1338 = vmatprep.subr.mxu0 %v1743_v0 }
  0xb1   : > { %1328 = vmatpush3.msra.mxu1 %v2110_v33  ;;  %1329 = vmatprep.mubr.msk.f32.mxu1 %vm1744_vm0, %v1743_v0 }
  0xb2   : > { %1339 = vmatpush3.msra.mxu0 %v397_v27  ;;  %1330 = vmatmul.mubr.f32.vlgmr.msra.gmra.mxu1 %v365_v45 }
  0xb3   : > { %1340 = vmatprep.subr.mxu0 %v1743_v0  ;;  %1367 = vmatprep.subr.mxu1 %v1743_v0 }
  0xb4   : > { %1341 = vmatpush3.msra.mxu0 %v404_v29  ;;  %1368 = vmatpush3.msra.mxu1 %v1970_v4  ;;  %v1084_v29 = vld [vmem:[%s1954_s5] ss:$0 sm:$0xff] }
  0xb5   : > { %1342 = vmatprep.subr.mxu0 %v1743_v0  ;;  %1369 = vmatprep.subr.mxu1 %v1743_v0 }
  0xb6   : > { %1343 = vmatpush3.msra.mxu0 %v411_v40  ;;  %1370 = vmatpush3.msra.mxu1 %v1972_v5 }
  0xb7   : > { %1344 = vmatprep.subr.mxu0 %v1743_v0  ;;  %1371 = vmatprep.subr.mxu1 %v1743_v0 }
  0xb8   : > { %1345 = vmatpush3.msra.mxu0 %v418_v46  ;;  %1372 = vmatpush3.msra.mxu1 %v1974_v6 }
  0xb9   : > { %1346 = vmatprep.subr.mxu0 %v1743_v0  ;;  %1373 = vmatprep.subr.mxu1 %v1743_v0 }
  0xba   : > { %1347 = vmatpush3.msra.mxu0 %v425_v53  ;;  %1374 = vmatpush3.msra.mxu1 %v1976_v10 }
  0xbb   : > { %1348 = vmatprep.subr.mxu0 %v1743_v0  ;;  %1375 = vmatprep.subr.mxu1 %v1743_v0 }
  0xbc   : > { %1349 = vmatpush3.msra.mxu0 %v432_v56  ;;  %1376 = vmatpush3.msra.mxu1 %v1978_v11 }
  0xbd   : > { %1350 = vmatprep.subr.mxu0 %v1743_v0  ;;  %1377 = vmatprep.subr.mxu1 %v1743_v0 }
  0xbe   : > { %1351 = vmatpush3.msra.mxu0 %v439_v7  ;;  %1378 = vmatpush3.msra.mxu1 %v1980_v12 }
  0xbf   : > { %1352 = vmatprep.subr.mxu0 %v1743_v0  ;;  %1379 = vmatprep.subr.mxu1 %v1743_v0 }
  0xc0   : > { %1353 = vmatpush3.msra.mxu0 %v446_v26  ;;  %1380 = vmatpush3.msra.mxu1 %v1989_v17 }
  0xc1   : > { %1354 = vmatprep.subr.mxu0 %v1743_v0  ;;  %1381 = vmatprep.subr.mxu1 %v1743_v0 }
  0xc2   : > { %1355 = vmatpush3.msra.mxu0 %v453_v38  ;;  %1382 = vmatpush3.msra.mxu1 %v2005_v25 }
  0xc3   : > { %1356 = vmatprep.subr.mxu0 %v1743_v0  ;;  %1383 = vmatprep.subr.mxu1 %v1743_v0 }
  0xc4   : > { %1357 = vmatpush3.msra.mxu0 %v460_v50  ;;  %1384 = vmatpush3.msra.mxu1 %v2009_v28 }
  0xc5   : > { %1358 = vmatprep.subr.mxu0 %v1743_v0  ;;  %1385 = vmatprep.subr.mxu1 %v1743_v0 }
  0xc6   : > { %1359 = vmatpush3.msra.mxu0 %v467_v57  ;;  %1386 = vmatpush3.msra.mxu1 %v2029_v36 }
  0xc7   : > { %1360 = vmatprep.subr.mxu0 %v1743_v0  ;;  %1387 = vmatprep.subr.mxu1 %v1743_v0 }
  0xc8   : > { %1361 = vmatpush3.msra.mxu0 %v474_v3  ;;  %1388 = vmatpush3.msra.mxu1 %v2037_v42 }
  0xc9   : > { %1362 = vmatprep.subr.mxu0 %v1743_v0  ;;  %1389 = vmatprep.subr.mxu1 %v1743_v0 }
  0xca   : > { %1363 = vmatpush3.msra.mxu0 %v481_v19  ;;  %1364 = vmatprep.mubr.msk.f32.mxu0 %vm1744_vm0, %v1743_v0 }
  0xcb   : > { %1390 = vmatpush3.msra.mxu1 %v2055_v49  ;;  %1365 = vmatmul.mubr.f32.vlgmr.msra.gmra.mxu0 %v2083_v1 }
  0xcc   : > { %1391 = vmatprep.subr.mxu1 %v1743_v0  ;;  %1399 = vmatprep.mubr.msk.f32.mxu1 %vm1744_vm0, %v1743_v0 }
  0xcd   : > { %1392 = vmatpush3.msra.mxu1 %v2074_v60 }
  0xce   : > { %1393 = vmatprep.subr.mxu1 %v1743_v0 }
  0xcf   : > { %1394 = vmatpush3.msra.mxu1 %v2081_v63 }
  0xd0   : > { %1395 = vmatprep.subr.mxu1 %v1743_v0 }
  0xd1   : > { %1396 = vmatpush3.msra.mxu1 %v2098_v14 }
  0xd2   : > { %1397 = vmatprep.subr.mxu1 %v1743_v0 }
  0xd3   : > { %1398 = vmatpush3.msra.mxu1 %v2110_v33 }
  0xd4   : > { %1400 = vmatmul.mubr.f32.vlgmr.msra.gmra.mxu1 %v2083_v1 }
 0x149   : > { %v369_v4 = vpop.f32.mrf.mxu0 }
 0x14b   : > { %v1226_v5 = vpop.f32.mrf.mxu0 }
 0x150   : > { %v520_v6 = vpop.f32.mrf.mxu1 }
 0x151   : > { %v521_v18 = vadd.f32 %v520_v6, %v369_v4 }
 0x152   : > { %v1261_v10 = vpop.f32.mrf.mxu1 }
 0x169   : > { %v624_v11 = vpop.f32.mrf.mxu0 }
 0x16a   : > { %v625_v0 = vadd.f32 %v624_v11, %v521_v18 }
 0x16b   : > { %v1296_v12 = vpop.f32.mrf.mxu0 }
 0x172   : > { %v713_v15 = vpop.f32.mrf.mxu1 }
 0x173   : > { %v714_v21 = vadd.f32 %v713_v15, %v625_v0 }
 0x174   : > { %v1331_v16 = vpop.f32.mrf.mxu1 }
 0x18b   : > { %v832_v17 = vpop.f32.mrf.mxu0 }
 0x18c   : > { %v833_v22 = vadd.f32 %v832_v17, %v714_v21 }
 0x18d   : > { %v1366_v20 = vpop.f32.mrf.mxu0 }
 0x194   : > { %v919_v23 = vpop.f32.mrf.mxu1 }
 0x195   : > { %v920_v24 = vadd.f32 %v919_v23, %v833_v22 }
 0x196   : > { %v1401_v25 = vpop.f32.mrf.mxu1 }
 0x197   : > { %v923_v27 = vmax.f32 %v920_v24, 1e-24 }
 0x199   : > { %1524 = vrsqrt.f32 %v923_v27 }
 0x1a6   : > { %v1525_v28 = vpop.eup %1524 }
 0x1a7   : > { %v926_v30 = vmul.f32 %v1525_v28, %v2051_v48 }
 0x1a9   : > { %v933_v35 = vmul.f32 %v1084_v29, %v926_v30 }
 0x1ab   : > { %934 = vst [vmem:[%s263_s12] sm:$0x3] %v933_v35 }
 0x1ac   : > { %1621 = shalt.err (!%p1618_p1)
}
 0x1ad   : > { %s1622_s5 = scalar_lea.hbm %s950_s26, 32  ;;  %s1626_s29 = scalar_lea.hbm %s2428_s30, 256 }
 0x1ae   : > { %p1623_p5 = scmp.ne.s32.totalorder %s950_s26, %s1622_s5  ;;  %p1627_p7 = scmp.lt.s32.totalorder %s950_s26, %s2428_s30 }
 0x1af   : > { %p1628_p3 = scmp.lt.s32.totalorder %s1626_s29, %s1622_s5 }
 0x1b0   : > { %p1624_p4 = pnand %p1623_p5, %p2429_p13 }
 0x1b1   : > { %p1629_p11 = por %p1628_p3, %p1627_p7 }
 0x1b2   : > { %p1625_p6 = pneg %p1624_p4 }
 0x1b4   : > { %p1630_p10 = pnand %p1629_p11, %p1625_p6 }
 0x1b6   : > { %1633 = shalt.err (!%p1630_p10)
}
 0x1b7   : > { %1410 = dma.vmem_to_hbm [thread:$0]  (%p2429_p13), %s953_s2, 32, %s950_s26, %s936_s24  }
 0x1b8 PF: > { %s2430_s12 = sld [smem:[#allocation13_spill]]  ;;  %p1430_p8 = scmp.ge.s32.totalorder %s1736_s22, 2 }
 0x1b9   : > { %p2431_p9 = scmp.ne.s32.totalorder %s2416_s28, 0 }
 0x1bb   : > { %p1424_p2 = pnand %p1430_p8, %p2431_p9 }
 0x1bd   : > { %p1425_p12 = pneg %p1424_p2 }
 0x1be   : > { %s964_s3 = sand.u32 1, %s2430_s12  }
 0x1bf   : > { %s965_s18 = scalar_lea.sflag [#allocation4], %s964_s3 }
 0x1c0   : > { %1691 = dma.done.wait (%p1425_p12), %s965_s18, 32  }
 0x1c1   : > { %1693 = vsyncadd (%p1425_p12), %s965_s18, 4294967264  ;;  %s22_s22 = sadd.s32 1, %s1736_s22   ;;  %s2432_s11 = sld [smem:[#allocation15_spill]] }
 0x1c2   : > { %p19_p0 = scmp.ge.s32.totalorder %s22_s22, 10   ;;  %s2433_s2 = sld [smem:[#allocation16_spill]] }
 0x1c3   : > { %s2434_s12 = smov %s1700_s13  ;;  %s2435_s13 = smov %s1704_s14 }
 0x1c4   : > { %s2436_s14 = smov %s1909_s6  ;;  %s2437_s15 = smov %s1712_s16 }
 0x1c5   : > { %s2438_s16 = smov %s1716_s17  ;;  %s2439_s17 = smov %s1885_s4 }
 0x1c6   : > { %s2440_s18 = smov %s1728_s20  ;;  %s2441_s19 = smov %s1732_s21 }
 0x1c7   : > { %s2442_s20 = smov %s2432_s11  ;;  %21 = sbr.rel (!%p19_p0) target bundleno = 14 (0xe), region = 94 }
 0x1c8   : > { %s2443_s21 = smov %s2433_s2 }
 0x1cc   :  { %970 = vsyncpa [#allocation3], 1 }
 0x1cd   :  { %972 = vsyncpa [#allocation3 + $0x1], 1 }
 0x1ce   :  { %973 = vsyncpa [#allocation6], 1 }
 0x1cf   :  { %975 = vsyncpa [#allocation6 + $0x1], 1 }
 0x1d0   :  { %976 = vsyncpa [#allocation4], 1 }
 0x1d1   :  { %978 = vsyncpa [#allocation4 + $0x1], 1 }

</bundles_post_ra>
